<compile_context>
chip_gen: v5e
topology: v5e:2x2
jax: 0.10.0
libtpu: 0.0.40
codegen_flags: <defaults>
</compile_context>

<pallas_src>
import math

import jax
import jax.numpy as jnp
import numpy as np
from jax.experimental import pallas as pl
from jax.experimental.pallas import tpu as pltpu


def _physical_vmem_bytes() -> int:
    """Per-TensorCore VMEM capacity (128 MiB on v5e/v6e, 64 MiB on v7x)."""
    try:
        return int(pltpu.get_tpu_info().vmem_capacity_bytes)
    except Exception:
        return 64 << 20          # conservative fallback (v7x per-TC)


def _working_set_bytes(C: int, T: int, W: int) -> int:
    """Estimated pipeline VMEM: f32 x tile + three bf16 output tiles (double-buffered),
    bf16 weights and the two skinny bf16 segment-selection matrices (double-buffered),
    plus small per-channel vectors / slack."""
    return (2 * 4 * C * T                    # x tile, f32, 2 buffers
            + 3 * 2 * 2 * C * T              # 3 aux outputs, bf16, 2 buffers
            + 2 * 2 * 2 * C * C              # wk + ww1, bf16, 2 buffers
            + 2 * 2 * 2 * T * (T // W)       # seg-sum / broadcast mats, bf16, 2 buffers
            + 64 * C + (1 << 16))


def _pick_hw_tile(HW_pad: int, W: int, C: int, B: int, budget: int,
                  cap: int = 2048) -> int:
    """Tile along flattened (padded) H*W: a multiple of lcm(128, W) so softmax segments
    never cross a tile and stores stay lane-dense; grown while it (a) still divides
    HW_pad, (b) fits the generation-specific VMEM budget, and (c) keeps >= 4 grid steps
    (>= 2 per TensorCore on v7x, and overlap for double-buffering)."""
    lcm = 128 * W // math.gcd(128, W)
    t = lcm
    while (t * 2 <= cap
           and HW_pad % (t * 2) == 0
           and _working_set_bytes(C, t * 2, W) <= budget
           and B * (HW_pad // (t * 2)) >= 4):
        t *= 2
    return t


def _gcc_fused_kernel(x_ref, wk_ref, bk_ref, ww1_ref, bw1_ref,
                      ssum_ref, sbc_ref, scale_ref, shift_ref,
                      sm_ref, w1o_ref, bn_ref):
    """One grid step = one (batch element, pixel tile).

    Layouts (channels on sublanes, flattened H*W pixels on lanes):
      x_ref                 : (1, C, T)   f32 input tile
      wk_ref / ww1_ref      : (C, C)      bf16 1x1-conv weights (f32 MXU accumulate)
      bk_ref / bw1_ref      : (C, 1)      f32 conv biases
      ssum_ref              : (T, T//W)   bf16 0/1: lane -> its W segment (seg sums)
      sbc_ref               : (T//W, T)   bf16 0/1: segment -> its lanes (broadcast)
      scale_ref / shift_ref : (C, 1)      f32 folded eval-mode BN affine (+1 residual)
      sm_ref/w1o_ref/bn_ref : (1, C, T)   bf16 aux outputs (lane-dense stores)
    """
    x = x_ref[0]                               # (C, T) f32
    xm = x.astype(wk_ref.dtype)                # bf16 MXU operand

    # k = kconv(x) and w1(x): 1x1 convs as channel-contraction MXU matmuls with pixels
    # on the lane axis; w1(x) is written straight out in bf16 (halved HBM write bytes).
    k = jnp.dot(wk_ref[...], xm, preferred_element_type=jnp.float32) + bk_ref[...]
    w1o_ref[0] = (jnp.dot(ww1_ref[...], xm, preferred_element_type=jnp.float32)
                  + bw1_ref[...]).astype(w1o_ref.dtype)

    # softmax(k, dim=W) * x, lane-dense, elementwise path kept f32 (no bf16 VPU on v5e):
    #  - per-row (per-channel) max is constant within every W segment of that row, hence
    #    a valid stabilizer (one XLU lane reduce, no reshape);
    #  - per-(c,h) segment sums via a skinny bf16 0/1 matmul (C,T)@(T,T//W);
    #  - reciprocal on the small (C,T//W) result (EUP), clamped so fully-underflowed
    #    segments produce 0 instead of NaN;
    #  - broadcast 1/sum back to each segment's lanes with a second skinny bf16 matmul.
    m = jnp.max(k, axis=-1, keepdims=True)                              # (C, 1)
    e = jnp.exp(k - m)                                                  # (C, T) f32, EUP
    seg_sum = jnp.dot(e.astype(ssum_ref.dtype), ssum_ref[...],
                      preferred_element_type=jnp.float32)               # (C, T//W)
    inv = pl.reciprocal(jnp.maximum(seg_sum, 1e-30), approx=True)       # EUP
    inv_full = jnp.dot(inv.astype(sbc_ref.dtype), sbc_ref[...],
                       preferred_element_type=jnp.float32)              # (C, T)
    sm_ref[0] = (e * inv_full * x).astype(sm_ref.dtype)

    # bn(x) + x with eval-mode BN folded to a per-channel affine and the residual "+x"
    # folded into the scale at trace time: (scale + 1) * x + shift.
    bn_ref[0] = (scale_ref[...] * x + shift_ref[...]).astype(bn_ref.dtype)


def global_context_conv(x, params, *, mxu_dtype=jnp.bfloat16, aux_dtype=jnp.bfloat16):
    """GlobalContextConv forward: returns (x, (softmax(k)*x, w1(x), bn(x)+x)).

    The PyTorch forward returns its input unchanged; the intermediates are returned as
    aux outputs only so their compute is not dead-code-eliminated."""
    B, C, H, W = x.shape
    HW = H * W

    # ---- generation-aware tiling / VMEM budget ---------------------------------------
    lcm = 128 * W // math.gcd(128, W)
    HW_pad = ((HW + lcm - 1) // lcm) * lcm          # pad H*W to a multiple of lcm(128,W)
    phys = _physical_vmem_bytes()
    budget = max(8 << 20, int(phys * 0.4))          # per-TC; constants live on both TCs
    T = _pick_hw_tile(HW_pad, W, C, B, budget)
    n_t = HW_pad // T
    vmem_limit = int(min(phys * 3 // 4,
                         max(32 << 20, 2 * _working_set_bytes(C, T, W))))

    wk, bk = params["wk"], params["bk"]
    ww1, bw1 = params["ww1"], params["bw1"]
    gamma, beta = params["gamma"], params["beta"]
    rmean, rvar = params["rmean"], params["rvar"]
    eps = params["eps"]

    # ---- glue (free / tiny): layout + parameter folding, no transposes ---------------
    x_cl = x.reshape(B, C, HW)                      # contiguous reshape only
    if HW_pad != HW:
        # TODO(synk): the pad costs one extra read+write of x; only hit when H*W is not
        # a multiple of lcm(128, W) — keeps every store lane-dense (no vst.msk).
        x_cl = jnp.pad(x_cl, ((0, 0), (0, 0), (0, HW_pad - HW)))

    wk_m = wk.astype(mxu_dtype)                     # bf16 MXU operands, f32 accumulate
    ww1_m = ww1.astype(mxu_dtype)
    bk_c = bk.reshape(C, 1).astype(jnp.float32)
    bw1_c = bw1.reshape(C, 1).astype(jnp.float32)

    # Fold eval-mode BatchNorm2d into a per-channel affine; fold the residual "+x".
    # TODO(synk): PyTorch default is training mode (batch statistics); the bn branch is
    # discarded by the forward, so eval-mode running stats are used here.
    scale = gamma / jnp.sqrt(rvar + eps)
    scale_p1 = (scale + 1.0).reshape(C, 1).astype(jnp.float32)
    shift = (beta - rmean * scale).reshape(C, 1).astype(jnp.float32)

    # Skinny 0/1 segment-selection matrices (0/1 is exact in bf16):
    #   ssum[i, s] = (i // W == s)  -> per-(c,h) segment sums via (C,T)@(T,T//W)
    #   sbc[s, i]  = (i // W == s)  -> broadcast 1/sum back to each segment's W lanes
    seg_of_lane = jnp.arange(T) // W
    seg_ids = jnp.arange(T // W)
    ssum = (seg_of_lane[:, None] == seg_ids[None, :]).astype(mxu_dtype)   # (T, T//W)
    sbc = (seg_ids[:, None] == seg_of_lane[None, :]).astype(mxu_dtype)    # (T//W, T)

    tile = pl.BlockSpec((1, C, T), lambda b, t: (b, 0, t))
    const = lambda shape: pl.BlockSpec(shape, lambda b, t: (0, 0))

    sm, w1o, bnx = pl.pallas_call(
        _gcc_fused_kernel,
        out_shape=tuple(
            jax.ShapeDtypeStruct((B, C, HW_pad), aux_dtype) for _ in range(3)
        ),
        grid=(B, n_t),
        in_specs=[
            tile,                      # x
            const((C, C)),             # wk
            const((C, 1)),             # bk
            const((C, C)),             # ww1
            const((C, 1)),             # bw1
            const((T, T // W)),        # segment-sum selection matrix
            const((T // W, T)),        # segment-broadcast selection matrix
            const((C, 1)),             # bn scale + 1
            const((C, 1)),             # bn shift
        ],
        out_specs=(tile, tile, tile),
        compiler_params=pltpu.CompilerParams(
            dimension_semantics=("parallel", "parallel"),
            vmem_limit_bytes=vmem_limit),
    )(x_cl, wk_m, bk_c, ww1_m, bw1_c, ssum, sbc, scale_p1, shift)

    def _back(a):
        if HW_pad != HW:
            a = a[:, :, :HW]
        return a.reshape(B, C, H, W)

    # Forward returns x unchanged — returned directly, no kernel pass-through write.
    return x, (_back(sm), _back(w1o), _back(bnx))


def _reference(x, params, mxu_dtype):
    """Pure-JAX reference for the aux intermediates, mirroring the kernel's declared
    numerics (bf16 MXU operands, f32 accumulation and elementwise path)."""
    xm = x.astype(mxu_dtype).astype(jnp.float32)
    wk = params["wk"].astype(mxu_dtype).astype(jnp.float32)
    ww1 = params["ww1"].astype(mxu_dtype).astype(jnp.float32)
    k = jnp.einsum("oc,bchw->bohw", wk, xm) + params["bk"][None, :, None, None]
    w1x = jnp.einsum("oc,bchw->bohw", ww1, xm) + params["bw1"][None, :, None, None]
    sm = jax.nn.softmax(k, axis=-1) * x
    inv = params["gamma"] / jnp.sqrt(params["rvar"] + params["eps"])
    bn = (inv[None, :, None, None] * (x - params["rmean"][None, :, None, None])
          + params["beta"][None, :, None, None]) + x
    return sm, w1x, bn


if __name__ == "__main__":
    B, C, H, W = 2, 4, 16, 16   # in_channels == out_channels (forward implies it)

    key = jax.random.PRNGKey(0)
    ks = jax.random.split(key, 7)
    x = jax.random.normal(ks[0], (B, C, H, W), dtype=jnp.float32)

    params = dict(
        # nn.Conv2d(C, C, kernel_size=1) weights: (C, C, 1, 1) -> stored (C, C)
        wk=0.5 * jax.random.normal(ks[1], (C, C), dtype=jnp.float32),
        bk=0.1 * jax.random.normal(ks[2], (C,), dtype=jnp.float32),
        ww1=0.5 * jax.random.normal(ks[3], (C, C), dtype=jnp.float32),
        bw1=0.1 * jax.random.normal(ks[4], (C,), dtype=jnp.float32),
        # nn.BatchNorm2d(C): affine params + running stats
        gamma=1.0 + 0.1 * jax.random.normal(ks[5], (C,), dtype=jnp.float32),
        beta=0.1 * jax.random.normal(ks[6], (C,), dtype=jnp.float32),
        rmean=jnp.zeros((C,), dtype=jnp.float32),
        rvar=jnp.ones((C,), dtype=jnp.float32),
        eps=jnp.float32(1e-5),
        # NOTE: self.w2 exists in __init__ but is never used in forward.
    )

    out, (sm, w1o, bnx) = jax.jit(global_context_conv)(x, params)
    jax.block_until_ready((out, sm, w1o, bnx))

    # Forward semantics: output is the input, unchanged.
    assert out.shape == x.shape and out.dtype == x.dtype
    assert jnp.array_equal(out, x), "forward must return x unchanged"

    # Aux intermediates vs. pure-JAX reference (tolerance covers bf16 MXU operands, the
    # bf16 segment-sum path, the approximate EUP reciprocal and bf16 output storage).
    sm_r, w1o_r, bn_r = _reference(x, params, jnp.bfloat16)
    np.testing.assert_allclose(np.asarray(sm.astype(jnp.float32)),
                               np.asarray(sm_r), rtol=5e-2, atol=5e-2)
    np.testing.assert_allclose(np.asarray(w1o.astype(jnp.float32)),
                               np.asarray(w1o_r), rtol=5e-2, atol=5e-2)
    np.testing.assert_allclose(np.asarray(bnx.astype(jnp.float32)),
                               np.asarray(bn_r), rtol=5e-2, atol=5e-2)

    print("KERNEL_OK")
</pallas_src>

<mosaic_0001>
module attributes {stable_mosaic.version = 11 : i64} {
  func.func @_gcc_fused_kernel(%arg0: i32, %arg1: i32, %arg2: memref<1x4x128xf32, #tpu.memory_space<vmem>>, %arg3: memref<4x4xbf16, #tpu.memory_space<vmem>>, %arg4: memref<4x1xf32, #tpu.memory_space<vmem>>, %arg5: memref<4x4xbf16, #tpu.memory_space<vmem>>, %arg6: memref<4x1xf32, #tpu.memory_space<vmem>>, %arg7: memref<128x8xbf16, #tpu.memory_space<vmem>>, %arg8: memref<8x128xbf16, #tpu.memory_space<vmem>>, %arg9: memref<4x1xf32, #tpu.memory_space<vmem>>, %arg10: memref<4x1xf32, #tpu.memory_space<vmem>>, %arg11: memref<1x4x128xbf16, #tpu.memory_space<vmem>>, %arg12: memref<1x4x128xbf16, #tpu.memory_space<vmem>>, %arg13: memref<1x4x128xbf16, #tpu.memory_space<vmem>>) attributes {dimension_semantics = [#tpu.dimension_semantics<parallel>, #tpu.dimension_semantics<parallel>], iteration_bounds = array<i64: 2, 2>, scalar_prefetch = 0 : i64, scratch_operands = 0 : i64, tpu.core_type = #tpu.core_type<tc>, window_params = [{transform_indices = @transform_0, window_bounds = array<i64: 1, 4, 128>}, {pipeline_mode = #tpu.pipeline_mode<synchronous>, transform_indices = @transform_1, window_bounds = array<i64: 4, 4>}, {pipeline_mode = #tpu.pipeline_mode<synchronous>, transform_indices = @transform_2, window_bounds = array<i64: 4, 1>}, {pipeline_mode = #tpu.pipeline_mode<synchronous>, transform_indices = @transform_3, window_bounds = array<i64: 4, 4>}, {pipeline_mode = #tpu.pipeline_mode<synchronous>, transform_indices = @transform_4, window_bounds = array<i64: 4, 1>}, {pipeline_mode = #tpu.pipeline_mode<synchronous>, transform_indices = @transform_5, window_bounds = array<i64: 128, 8>}, {pipeline_mode = #tpu.pipeline_mode<synchronous>, transform_indices = @transform_6, window_bounds = array<i64: 8, 128>}, {pipeline_mode = #tpu.pipeline_mode<synchronous>, transform_indices = @transform_7, window_bounds = array<i64: 4, 1>}, {pipeline_mode = #tpu.pipeline_mode<synchronous>, transform_indices = @transform_8, window_bounds = array<i64: 4, 1>}, {transform_indices = @transform_9, window_bounds = array<i64: 1, 4, 128>}, {transform_indices = @transform_10, window_bounds = array<i64: 1, 4, 128>}, {transform_indices = @transform_11, window_bounds = array<i64: 1, 4, 128>}]} {
    %c0 = arith.constant 0 : index
    %c0_0 = arith.constant 0 : index
    %c0_1 = arith.constant 0 : index
    %0 = vector.load %arg2[%c0, %c0_0, %c0_1] : memref<1x4x128xf32, #tpu.memory_space<vmem>>, vector<1x4x128xf32>
    %1 = vector.shape_cast %0 : vector<1x4x128xf32> to vector<4x128xf32>
    %2 = arith.truncf %1 : vector<4x128xf32> to vector<4x128xbf16>
    %c0_2 = arith.constant 0 : index
    %c0_3 = arith.constant 0 : index
    %3 = vector.load %arg3[%c0_2, %c0_3] : memref<4x4xbf16, #tpu.memory_space<vmem>>, vector<4x4xbf16>
    %cst = arith.constant dense<0.000000e+00> : vector<4x128xf32>
    %4 = tpu.matmul %3, %2, %cst {dimension_numbers = #tpu.dot_dimension_numbers<[1], [0], [0], [1], [0, 0, 1, 1], [], []>} : vector<4x4xbf16>, vector<4x128xbf16>, vector<4x128xf32> -> vector<4x128xf32>
    %c0_4 = arith.constant 0 : index
    %c0_5 = arith.constant 0 : index
    %5 = vector.load %arg4[%c0_4, %c0_5] : memref<4x1xf32, #tpu.memory_space<vmem>>, vector<4x1xf32>
    %6 = vector.broadcast %5 : vector<4x1xf32> to vector<4x128xf32>
    %7 = arith.addf %4, %6 : vector<4x128xf32>
    %c0_6 = arith.constant 0 : index
    %c0_7 = arith.constant 0 : index
    %8 = vector.load %arg5[%c0_6, %c0_7] : memref<4x4xbf16, #tpu.memory_space<vmem>>, vector<4x4xbf16>
    %cst_8 = arith.constant dense<0.000000e+00> : vector<4x128xf32>
    %9 = tpu.matmul %8, %2, %cst_8 {dimension_numbers = #tpu.dot_dimension_numbers<[1], [0], [0], [1], [0, 0, 1, 1], [], []>} : vector<4x4xbf16>, vector<4x128xbf16>, vector<4x128xf32> -> vector<4x128xf32>
    %c0_9 = arith.constant 0 : index
    %c0_10 = arith.constant 0 : index
    %10 = vector.load %arg6[%c0_9, %c0_10] : memref<4x1xf32, #tpu.memory_space<vmem>>, vector<4x1xf32>
    %11 = vector.broadcast %10 : vector<4x1xf32> to vector<4x128xf32>
    %12 = arith.addf %9, %11 : vector<4x128xf32>
    %13 = arith.truncf %12 : vector<4x128xf32> to vector<4x128xbf16>
    %c0_11 = arith.constant 0 : index
    %c0_12 = arith.constant 0 : index
    %c0_13 = arith.constant 0 : index
    %14 = vector.load %arg12[%c0_11, %c0_12, %c0_13] : memref<1x4x128xbf16, #tpu.memory_space<vmem>>, vector<1x4x128xbf16>
    %15 = vector.shape_cast %14 : vector<1x4x128xbf16> to vector<4x128xbf16>
    %16 = vector.shape_cast %13 : vector<4x128xbf16> to vector<1x4x128xbf16>
    tpu.vector_store %arg12[%c0_11, %c0_12, %c0_13], %16 {strides = array<i32>} : memref<1x4x128xbf16, #tpu.memory_space<vmem>>, vector<1x4x128xbf16>,
    %cst_14 = arith.constant dense<0xFF800000> : vector<4xf32>
    %17 = vector.multi_reduction <maximumf>, %7, %cst_14 [1] : vector<4x128xf32> to vector<4xf32>
    %18 = vector.shape_cast %17 : vector<4xf32> to vector<4x1xf32>
    %19 = vector.broadcast %18 : vector<4x1xf32> to vector<4x128xf32>
    %20 = arith.subf %7, %19 : vector<4x128xf32>
    %21 = math.exp %20 : vector<4x128xf32>
    %22 = arith.truncf %21 : vector<4x128xf32> to vector<4x128xbf16>
    %c0_15 = arith.constant 0 : index
    %c0_16 = arith.constant 0 : index
    %23 = vector.load %arg7[%c0_15, %c0_16] : memref<128x8xbf16, #tpu.memory_space<vmem>>, vector<128x8xbf16>
    %cst_17 = arith.constant dense<0.000000e+00> : vector<4x8xf32>
    %24 = tpu.matmul %22, %23, %cst_17 {dimension_numbers = #tpu.dot_dimension_numbers<[1], [0], [0], [1], [0, 0, 1, 1], [], []>} : vector<4x128xbf16>, vector<128x8xbf16>, vector<4x8xf32> -> vector<4x8xf32>
    %cst_18 = arith.constant 1.000000e-30 : f32
    %25 = vector.broadcast %cst_18 : f32 to vector<4x8xf32>
    %26 = arith.maximumf %24, %25 : vector<4x8xf32>
    %27 = tpu.reciprocal %26 {approx = true} : vector<4x8xf32> -> vector<4x8xf32>
    %28 = arith.truncf %27 : vector<4x8xf32> to vector<4x8xbf16>
    %c0_19 = arith.constant 0 : index
    %c0_20 = arith.constant 0 : index
    %29 = vector.load %arg8[%c0_19, %c0_20] : memref<8x128xbf16, #tpu.memory_space<vmem>>, vector<8x128xbf16>
    %cst_21 = arith.constant dense<0.000000e+00> : vector<4x128xf32>
    %30 = tpu.matmul %28, %29, %cst_21 {dimension_numbers = #tpu.dot_dimension_numbers<[1], [0], [0], [1], [0, 0, 1, 1], [], []>} : vector<4x8xbf16>, vector<8x128xbf16>, vector<4x128xf32> -> vector<4x128xf32>
    %31 = arith.mulf %21, %30 : vector<4x128xf32>
    %32 = arith.mulf %31, %1 : vector<4x128xf32>
    %33 = arith.truncf %32 : vector<4x128xf32> to vector<4x128xbf16>
    %c0_22 = arith.constant 0 : index
    %c0_23 = arith.constant 0 : index
    %c0_24 = arith.constant 0 : index
    %34 = vector.load %arg11[%c0_22, %c0_23, %c0_24] : memref<1x4x128xbf16, #tpu.memory_space<vmem>>, vector<1x4x128xbf16>
    %35 = vector.shape_cast %34 : vector<1x4x128xbf16> to vector<4x128xbf16>
    %36 = vector.shape_cast %33 : vector<4x128xbf16> to vector<1x4x128xbf16>
    tpu.vector_store %arg11[%c0_22, %c0_23, %c0_24], %36 {strides = array<i32>} : memref<1x4x128xbf16, #tpu.memory_space<vmem>>, vector<1x4x128xbf16>,
    %c0_25 = arith.constant 0 : index
    %c0_26 = arith.constant 0 : index
    %37 = vector.load %arg9[%c0_25, %c0_26] : memref<4x1xf32, #tpu.memory_space<vmem>>, vector<4x1xf32>
    %38 = vector.broadcast %37 : vector<4x1xf32> to vector<4x128xf32>
    %39 = arith.mulf %38, %1 : vector<4x128xf32>
    %c0_27 = arith.constant 0 : index
    %c0_28 = arith.constant 0 : index
    %40 = vector.load %arg10[%c0_27, %c0_28] : memref<4x1xf32, #tpu.memory_space<vmem>>, vector<4x1xf32>
    %41 = vector.broadcast %40 : vector<4x1xf32> to vector<4x128xf32>
    %42 = arith.addf %39, %41 : vector<4x128xf32>
    %43 = arith.truncf %42 : vector<4x128xf32> to vector<4x128xbf16>
    %c0_29 = arith.constant 0 : index
    %c0_30 = arith.constant 0 : index
    %c0_31 = arith.constant 0 : index
    %44 = vector.load %arg13[%c0_29, %c0_30, %c0_31] : memref<1x4x128xbf16, #tpu.memory_space<vmem>>, vector<1x4x128xbf16>
    %45 = vector.shape_cast %44 : vector<1x4x128xbf16> to vector<4x128xbf16>
    %46 = vector.shape_cast %43 : vector<4x128xbf16> to vector<1x4x128xbf16>
    tpu.vector_store %arg13[%c0_29, %c0_30, %c0_31], %46 {strides = array<i32>} : memref<1x4x128xbf16, #tpu.memory_space<vmem>>, vector<1x4x128xbf16>,
    return
  }
  func.func @transform_0(%arg0: i32, %arg1: i32) -> (i32, i32, i32) {
    %c0_i32 = arith.constant 0 : i32
    %c0_i32_0 = arith.constant 0 : i32
    return %arg0, %c0_i32, %arg1 : i32, i32, i32
  }
  func.func @transform_1(%arg0: i32, %arg1: i32) -> (i32, i32) {
    %c0_i32 = arith.constant 0 : i32
    %c0_i32_0 = arith.constant 0 : i32
    %c0_i32_1 = arith.constant 0 : i32
    return %c0_i32, %c0_i32_0 : i32, i32
  }
  func.func @transform_2(%arg0: i32, %arg1: i32) -> (i32, i32) {
    %c0_i32 = arith.constant 0 : i32
    %c0_i32_0 = arith.constant 0 : i32
    %c0_i32_1 = arith.constant 0 : i32
    return %c0_i32, %c0_i32_0 : i32, i32
  }
  func.func @transform_3(%arg0: i32, %arg1: i32) -> (i32, i32) {
    %c0_i32 = arith.constant 0 : i32
    %c0_i32_0 = arith.constant 0 : i32
    %c0_i32_1 = arith.constant 0 : i32
    return %c0_i32, %c0_i32_0 : i32, i32
  }
  func.func @transform_4(%arg0: i32, %arg1: i32) -> (i32, i32) {
    %c0_i32 = arith.constant 0 : i32
    %c0_i32_0 = arith.constant 0 : i32
    %c0_i32_1 = arith.constant 0 : i32
    return %c0_i32, %c0_i32_0 : i32, i32
  }
  func.func @transform_5(%arg0: i32, %arg1: i32) -> (i32, i32) {
    %c0_i32 = arith.constant 0 : i32
    %c0_i32_0 = arith.constant 0 : i32
    %c0_i32_1 = arith.constant 0 : i32
    return %c0_i32, %c0_i32_0 : i32, i32
  }
  func.func @transform_6(%arg0: i32, %arg1: i32) -> (i32, i32) {
    %c0_i32 = arith.constant 0 : i32
    %c0_i32_0 = arith.constant 0 : i32
    %c0_i32_1 = arith.constant 0 : i32
    return %c0_i32, %c0_i32_0 : i32, i32
  }
  func.func @transform_7(%arg0: i32, %arg1: i32) -> (i32, i32) {
    %c0_i32 = arith.constant 0 : i32
    %c0_i32_0 = arith.constant 0 : i32
    %c0_i32_1 = arith.constant 0 : i32
    return %c0_i32, %c0_i32_0 : i32, i32
  }
  func.func @transform_8(%arg0: i32, %arg1: i32) -> (i32, i32) {
    %c0_i32 = arith.constant 0 : i32
    %c0_i32_0 = arith.constant 0 : i32
    %c0_i32_1 = arith.constant 0 : i32
    return %c0_i32, %c0_i32_0 : i32, i32
  }
  func.func @transform_9(%arg0: i32, %arg1: i32) -> (i32, i32, i32) {
    %c0_i32 = arith.constant 0 : i32
    %c0_i32_0 = arith.constant 0 : i32
    return %arg0, %c0_i32, %arg1 : i32, i32, i32
  }
  func.func @transform_10(%arg0: i32, %arg1: i32) -> (i32, i32, i32) {
    %c0_i32 = arith.constant 0 : i32
    %c0_i32_0 = arith.constant 0 : i32
    return %arg0, %c0_i32, %arg1 : i32, i32, i32
  }
  func.func @transform_11(%arg0: i32, %arg1: i32) -> (i32, i32, i32) {
    %c0_i32 = arith.constant 0 : i32
    %c0_i32_0 = arith.constant 0 : i32
    return %arg0, %c0_i32, %arg1 : i32, i32, i32
  }
}

</mosaic_0001>

<bundles_post_ra>
// kernel: global_context_conv.1
= control target key start
LH: loop header
LB: loop body
LE: loop exit
PB: predicated region body
PF: predicated region fallthrough
CT: control target
= control target key end

     0   :  { %s1031_s17 = smov 0   ;;  %s1033_s18 = smov 0   ;;  %s1147_s0 = inlined_call_operand.vmem [shape: f32[2,4,256], index: 0, kind: input, shape index: {}]   ;;  %s1148_s1 = inlined_call_operand.vmem [shape: bf16[4,4], index: 1, kind: input, shape index: {}]   ;;  %s1149_s2 = inlined_call_operand.vmem [shape: f32[4,1], index: 2, kind: input, shape index: {}]   ;;  %s1150_s3 = inlined_call_operand.vmem [shape: bf16[4,4], index: 3, kind: input, shape index: {}]   ;;  %s1151_s4 = inlined_call_operand.vmem [shape: f32[4,1], index: 4, kind: input, shape index: {}]   ;;  %s1152_s5 = inlined_call_operand.vmem [shape: bf16[128,8], index: 5, kind: input, shape index: {}]   ;;  %s1153_s6 = inlined_call_operand.vmem [shape: bf16[8,128], index: 6, kind: input, shape index: {}]   ;;  %s1154_s7 = inlined_call_operand.vmem [shape: f32[4,1], index: 7, kind: input, shape index: {}]   ;;  %s1155_s8 = inlined_call_operand.vmem [shape: f32[4,1], index: 8, kind: input, shape index: {}]   ;;  %s1156_s9 = inlined_call_operand.vmem [shape: bf16[2,4,256], index: 9, kind: output, shape index: {0}]   ;;  %s1157_s10 = inlined_call_operand.vmem [shape: bf16[2,4,256], index: 10, kind: output, shape index: {1}]   ;;  %s1158_s11 = inlined_call_operand.vmem [shape: bf16[2,4,256], index: 11, kind: output, shape index: {2}]  }
   0x1   :  { %s1035_s19 = smov 0   ;;  %s1037_s20 = smov 0  }
   0x2   :  { %s1039_s21 = smov 0  }
   0x3 LB: > { %s31_s22 = sadd.s32 1, %s960_s19  ;;  %s34_s23 = sadd.s32 1, %s964_s20  ;;  %s968_s21 = sphi %s1039_s21, %s22_s21   ;;  %s964_s20 = sphi %s1037_s20, %s1162_s20   ;;  %s960_s19 = sphi %s1035_s19, %s1161_s19   ;;  %s956_s18 = sphi %s1033_s18, %s1160_s18   ;;  %s952_s17 = sphi %s1031_s17, %s1159_s17  }
   0x4   : > { %p32_p0 = scmp.ge.s32.totalorder %s31_s22, 2  ;;  %p828_p1 = scmp.ge.s32.totalorder %s968_s21, 1 }
   0x5   : > { %p365_p2 = scmp.lt.s32.totalorder %s968_s21, 5 }
   0x6   : > { %s1164_s22 = smov (%p32_p0, %s31_s22), 0  ;;  %s1166_s23 = smov (!%p32_p0, %s34_s23), %s964_s20 }
   0x7   : > { %p366_p3 = pnand %p828_p1, %p365_p2  ;;  %p36_p4 = scmp.ge.s32.totalorder %s1166_s23, 2 }
   0x8   : > { %p427_p5 = scmp.lt.s32.totalorder (!%p366_p3), %s956_s18, 1  ;;  %p429_p6 = scmp.lt.s32.totalorder (!%p366_p3), %s952_s17, 1 }
   0x9   : > { %s1168_s23 = smov (%p36_p4, %s1166_s23), 0  ;;  %369 = sbr.rel (%p366_p3) target bundleno = 567 (0x237), region = 56 }
   0xe   : > { %v463_v0 = vld [vmem:[%s1149_s2] sm:$0xf]  ;;  %s1170_s18 = smov (!%p427_p5, %s956_s18), 1  ;;  %v970_v1 = vmov 0   ;;  %s1172_s17 = smov (!%p429_p6, %s952_s17), 1  ;;  %vm473_vm0 = vcmask 1041408  }
   0xf   : > { %923 = vset.pattern.permute.xlu0 %v970_v1  ;;  %924 = vset.pattern.permute.xlu1 %v970_v1  ;;  %s829_s26 = sshll.u32 %s1170_s18, 1  ;;  %v462_v5 = vld [vmem:[%s1148_s1] sm:$0x3]  ;;  %vm469_vm1 = vcmask 31744   ;;  %v881_v6 = vld [vmem:[%s1152_s5 + $0x38] sm:$0xff]  ;;  %v880_v7 = vld [vmem:[%s1152_s5 + $0x30] sm:$0xff] }
  0x10   : > { %466 = vperm.xlu0 %923, %v463_v0   ;;  %925 = vset.pattern.permute.xlu2 %v970_v1  ;;  %s1064_s27 = sadd.s32 %s829_s26, %s1172_s17  ;;  %v879_v8 = vld [vmem:[%s1152_s5 + $0x28] sm:$0xff]  ;;  %v878_v9 = vld [vmem:[%s1152_s5 + $0x20] sm:$0xff]  ;;  %v877_v10 = vld [vmem:[%s1152_s5 + $0x18] sm:$0xff]  ;;  %vm515_vm2 = vcmask 1043456   ;;  %vm604_vm3 = vcmask 64512  }
  0x11   : > { %s830_s28 = sshll.u32 %s1064_s27, 2  ;;  %587 = vmatpush.bf16.msra.mxu2 %v881_v6  ;;  %v876_v16 = vld [vmem:[%s1152_s5 + $0x10] sm:$0xff]  ;;  %v875_v17 = vld [vmem:[%s1152_s5 + $0x8] sm:$0xff]  ;;  %v874_v18 = vld [vmem:[%s1152_s5] sm:$0xff]  ;;  %s832_s15 = sshll.u32 %s1064_s27, 1 }
  0x12   : > { %s434_s12 = scalar_lea.vmem %s1147_s0, %s830_s28  ;;  %v603_v24 = vld [vmem:[%s1153_s6] sm:$0xf]  ;;  %s458_s18 = scalar_lea.vmem %s1158_s11, %s832_s15 }
  0x13   : > { %v1070_v2 = vld [vmem:[%s434_s12] sm:$0xf]  ;;  %v609_v25 = vsel %vm515_vm2, %v603_v24, 0  ;;  %s450_s26 = scalar_lea.vmem %s1157_s10, %s832_s15  ;;  %s442_s29 = scalar_lea.vmem %s1156_s9, %s832_s15 }
  0x14   : > { %v461_v3 = vpack.c.bf16 %v1070_v2, %v1070_v2  ;;  %618 = vmatpush.bf16.msra.mxu3 %v609_v25  ;;  %v490_v26 = vld [vmem:[%s1150_s3] sm:$0x3] }
  0x15   : > { %588 = vmatpush.bf16.msra.mxu2 %v880_v7  ;;  %v628_v27 = vld [vmem:[%s1154_s7] sm:$0xf] }
  0x16   : > { %v475_v4 = vsel %vm473_vm0, %v461_v3, 0  ;;  %v635_v28 = vld [vmem:[%s1155_s8] sm:$0xf]  ;;  %631 = vperm.xlu1 %924, %v628_v27  }
  0x17   : > { %484 = vmatpush.bf16.msra.mxu0 %v475_v4  ;;  %507 = vmatpush.bf16.msra.mxu1 %v475_v4  ;;  %v491_v29 = vld [vmem:[%s1151_s4] sm:$0xf] }
  0x18   : > { %638 = vperm.xlu2 %925, %v635_v28  }
  0x19   : > { %589 = vmatpush.bf16.msra.mxu2 %v879_v8 }
  0x1a   : > { %837 = vmatmul.msk.bf16.vlgmr.msra.gmra.mxu0 %vm469_vm1, %v462_v5  ;;  %838 = vmatmul.msk.bf16.vlgmr.msra.gmra.mxu1 %vm469_vm1, %v490_v26 }
  0x1d   : > { %590 = vmatpush.bf16.msra.mxu2 %v878_v9 }
  0x1e   : > { %494 = vperm.xlu1 %924, %v491_v29  }
  0x21   : > { %591 = vmatpush.bf16.msra.mxu2 %v877_v10 }
  0x25   : > { %592 = vmatpush.bf16.msra.mxu2 %v876_v16 }
  0x29   : > { %593 = vmatpush.bf16.msra.mxu2 %v875_v17 }
  0x2d   : > { %594 = vmatpush.bf16.msra.mxu2 %v874_v18 }
  0x72   : > { %v639_v36 = vpop.permute.xlu2 %638 }
  0x82   : > { %v467_v11 = vpop.permute.xlu0 %466 }
  0x88   : > { %v632_v35 = vpop.permute.xlu1 %631 }
  0x89   : > { %v634_v37 = vmul.f32 %v632_v35, %v1070_v2 }
  0x8b   : > { %v641_v38 = vadd.f32 %v639_v36, %v634_v37 }
  0x8d   : > { %v642_v39 = vpack.c.bf16 %v641_v38, %v641_v38 }
  0x8f   : > { %643 = vst [vmem:[%s458_s18] sm:$0x3] %v642_v39 }
  0x90   : > { %v495_v41 = vpop.permute.xlu1 %494 }
  0x97   : > { %v486_v12 = vpop.f32.mrf.mxu0  ;;  %v509_v40 = vpop.f32.mrf.mxu1 }
  0x98   : > { %v487_v13 = vadd.f32 %v486_v12, %v467_v11  ;;  %v510_v42 = vadd.f32 %v509_v40, %v495_v41 }
  0x9a   : > { %v516_v14 = vsel %vm515_vm2, %v487_v13, -inf  ;;  %v513_v43 = vpack.c.bf16 %v510_v42, %v510_v42 }
  0x9b   : > { %517 = vmax.xlane.f32.xlu0 %v516_v14 }
  0x9c   : > { %514 = vst [vmem:[%s450_s26] sm:$0x3] %v513_v43 }
  0x9f   : > { %v488_v15 = vpop.f32.mrf.mxu0  ;;  %v511_v44 = vpop.f32.mrf.mxu1 }
 0x10e   : > { %v518_v19 = vpop.xlane.xlu0 %517 }
 0x10f   : > { %v519_v20 = vsub.f32 %v487_v13, %v518_v19 }
 0x111   : > { %v520_v21 = vmul.f32 1.442695, %v519_v20 }
 0x113   : > { %926 = vpow2.f32 %v520_v21 }
 0x119   : > { %v927_v22 = vpop.eup %926 }
 0x11a   : > { %v522_v23 = vpack.c.bf16 %v927_v22, %v927_v22 }
 0x11c   : > { %595 = vmatmul.bf16.vlgmr.msra.gmra.mxu2 %v522_v23 }
 0x19f   : > { %v596_v30 = vpop.f32.mrf.mxu2 }
 0x1a0   : > { %v600_v31 = vmax.f32 %v596_v30, 1e-30 }
 0x1a2   : > { %928 = vrcp.f32 %v600_v31 }
 0x1a7   : > { %v598_v32 = vpop.f32.mrf.mxu2 }
 0x1a8   : > { %v929_v33 = vpop.eup %928 }
 0x1a9   : > { %v602_v34 = vpack.c.bf16 %v929_v33, %v929_v33 }
 0x1ab   : > { %871 = vmatmul.msk.bf16.vlgmr.msra.gmra.mxu3 %vm604_vm3, %v602_v34 }
 0x22e   : > { %v620_v45 = vpop.f32.mrf.mxu3 }
 0x22f   : > { %v624_v46 = vmul.f32 %v927_v22, %v620_v45 }
 0x231   : > { %v625_v47 = vmul.f32 %v624_v46, %v1070_v2 }
 0x233   : > { %v626_v48 = vpack.c.bf16 %v625_v47, %v625_v47 }
 0x235   : > { %627 = vst [vmem:[%s442_s29] sm:$0x3] %v626_v48 }
 0x236   : > { %v622_v49 = vpop.f32.mrf.mxu3 }
 0x237 PF: > { %s22_s21 = sadd.s32 1, %s968_s21   ;;  %s1159_s17 = smov %s960_s19 }
 0x238   : > { %p19_p7 = scmp.ge.s32.totalorder %s22_s21, 6   ;;  %s1160_s18 = smov %s964_s20 }
 0x239   : > { %s1161_s19 = smov %s1164_s22  ;;  %s1162_s20 = smov %s1168_s23 }
 0x23a   :  { %21 = sbr.rel (!%p19_p7) target bundleno = 3 (0x3), region = 110 }

</bundles_post_ra>
